<compile_context>
chip_gen: v5e
topology: v5e:2x2
jax: 0.10.0
libtpu: 0.0.40
codegen_flags: <defaults>
</compile_context>

<pallas_src>
import math
from functools import lru_cache

import jax
import jax.numpy as jnp
from jax.experimental import pallas as pl
from jax.experimental.pallas import tpu as pltpu


_ENSEMBLE_FUSE_MAX_BYTES = 1 << 20   # fuse 'tail' members only when this small


@lru_cache(maxsize=None)
def _device_config():
    """Per-generation DMA-block / VMEM budgets (kernel is HBM-bandwidth-bound)."""
    try:
        kind = jax.devices()[0].device_kind.lower()
    except Exception:
        kind = ""
    if "v7" in kind:
        # 3.2 TB/s HBM + ~0.35us fixed per-grid-step overhead -> bigger blocks.
        # Only 64 MiB physical VMEM: double-buffered footprint ~4x block stays
        # well under the 44 MiB scoped limit. 2 TCs -> need >=2 parallel steps.
        return {"block_bytes": 5 << 20, "vmem_limit": 44 << 20, "two_step": True}
    # v5e / v6e: ~85% of HBM roofline is already reached around 1-2 MiB blocks;
    # don't over-tune this lever.
    return {"block_bytes": 2 << 20, "vmem_limit": 32 << 20, "two_step": False}


def _scale_kernel(x_ref, s_ref, o_ref):
    # Works for 2-D blocks ((tr, tc) * (1, tc)) and 3-D blocks
    # ((1, tr, tc) * (1, 1, tc)) via broadcasting.  Multiply in the promoted
    # (output) dtype so bf16 inputs with f32 scale match PyTorch promotion.
    o_ref[...] = x_ref[...].astype(o_ref.dtype) * s_ref[...].astype(o_ref.dtype)


def _make_resident_scale_kernel(tc):
    """Kernel used when the feature axis is split: the full scale row stays
    resident in VMEM (constant block index) and the kernel slices the chunk it
    needs, instead of re-DMAing a (1, tc) scale block on every grid step."""
    def kernel(x_ref, s_ref, o_ref):
        start = pl.multiple_of(pl.program_id(1) * tc, 128)
        s = s_ref[:, pl.ds(start, tc)]
        o_ref[...] = x_ref[...].astype(o_ref.dtype) * s.astype(o_ref.dtype)
    return kernel


def _sublane_multiple(dtype) -> int:
    itemsize = jnp.dtype(dtype).itemsize
    if itemsize >= 4:
        return 8
    if itemsize == 2:
        return 16
    return 32


def _fold_factor(rows: int, dim: int) -> int:
    """Fold rows into the lane axis so the last dim becomes a multiple of 128."""
    if dim % 128 == 0:
        return 1
    f = 128 // math.gcd(dim, 128)
    if f > 1 and rows % f == 0:
        return f
    return 1


def _choose_tiles(rows: int, dim: int, dtype) -> tuple:
    """Pick (row_tile, feature_tile) under a device-aware byte budget."""
    cfg = _device_config()
    budget = cfg["block_bytes"]
    itemsize = jnp.dtype(dtype).itemsize
    sub = _sublane_multiple(dtype)

    # Feature (lane) tile: prefer full width -> contiguous DMAs, 1-D grid and a
    # resident scale row.  Only split when a minimum-height full-width block
    # exceeds the budget (and then only if 128-divisible; wrapper pads if not).
    if dim % 128 != 0 or sub * dim * itemsize <= budget:
        tc = dim
    else:
        tc = max((budget // (sub * itemsize)) // 128 * 128, 128)
        tc = min(tc, dim)

    # Row (sublane) tile from the byte budget, rounded to the packing multiple.
    tr = (budget // max(tc * itemsize, 1)) // sub * sub
    tr = max(tr, sub)
    if tr >= rows:
        tr = rows

    # v7x megacore: both TensorCores only get work if a parallel grid axis has
    # >= 2 steps; halve the row tile when the whole tensor fits in one block.
    if (cfg["two_step"] and pl.cdiv(rows, tr) == 1 and pl.cdiv(dim, tc) == 1
            and rows >= 2 * sub):
        tr = max(pl.cdiv(pl.cdiv(rows, 2), sub) * sub, sub)

    return tr, tc


def scale_layer(x: jax.Array, scale: jax.Array) -> jax.Array:
    """y = x * scale, scale broadcast along the last axis of x."""
    orig_shape = x.shape
    dim = orig_shape[-1]
    assert scale.shape == (dim,)

    rows = math.prod(orig_shape[:-1])
    out_dtype = jnp.result_type(x.dtype, scale.dtype)

    # Lane folding: 128-lane-dense blocks when the row count allows it.
    f = _fold_factor(rows, dim)
    rows_e, dim_e = rows // f, dim * f

    x2 = x.reshape(rows_e, dim_e)
    s_vec = jnp.tile(scale, f) if f > 1 else scale
    s2 = s_vec.reshape(1, dim_e)

    # Robustness guard (huge irregular dims): pad the feature axis to a 128
    # multiple so it can be tiled instead of forcing an over-budget block.
    cfg = _device_config()
    itemsize = jnp.dtype(out_dtype).itemsize
    sub = _sublane_multiple(out_dtype)
    pad = 0
    if dim_e % 128 != 0 and sub * dim_e * itemsize > cfg["block_bytes"]:
        pad = (-dim_e) % 128
        x2 = jnp.pad(x2, ((0, 0), (0, pad)))
        s2 = jnp.pad(s2, ((0, 0), (0, pad)))
    dim_p = dim_e + pad

    tr, tc = _choose_tiles(rows_e, dim_p, out_dtype)
    grid = (pl.cdiv(rows_e, tr), pl.cdiv(dim_p, tc))

    if grid[1] > 1 and dim_p % tc == 0:
        # Feature axis split: keep the whole scale row resident in VMEM.
        kernel = _make_resident_scale_kernel(tc)
        s_spec = pl.BlockSpec((1, dim_p), lambda i, j: (0, 0))
    else:
        kernel = _scale_kernel
        s_spec = pl.BlockSpec((1, tc), lambda i, j: (0, j))

    out = pl.pallas_call(
        kernel,
        out_shape=jax.ShapeDtypeStruct((rows_e, dim_p), out_dtype),
        grid_spec=pltpu.PrefetchScalarGridSpec(
            num_scalar_prefetch=0,
            grid=grid,
            in_specs=[pl.BlockSpec((tr, tc), lambda i, j: (i, j)), s_spec],
            out_specs=pl.BlockSpec((tr, tc), lambda i, j: (i, j)),
        ),
        compiler_params=pltpu.CompilerParams(
            dimension_semantics=("parallel", "parallel"),
            vmem_limit_bytes=cfg["vmem_limit"],
        ),
    )(x2, s2)

    if pad:
        out = out[:, :dim_e]
    return out.reshape(orig_shape)


def scale_layer_ensemble(xs, scales):
    """'tail' path: per-member kernels, fused only when members are tiny."""
    n = len(xs)
    if n == 0:
        return []
    shape0, dtype0 = xs[0].shape, xs[0].dtype
    homogeneous = (
        len(scales) == n
        and all(x.shape == shape0 and x.dtype == dtype0 for x in xs)
        and all(s.shape == scales[0].shape and s.dtype == scales[0].dtype
                for s in scales)
    )
    member_bytes = (math.prod(shape0) * jnp.dtype(dtype0).itemsize
                    if homogeneous else None)

    if not homogeneous or member_bytes > _ENSEMBLE_FUSE_MAX_BYTES:
        # The jnp.stack fusion re-reads + re-writes every member (a full extra
        # HBM pass) just to save a few microseconds of launch overhead, so it
        # only pays for tiny members.  Issue one bandwidth-optimal call each.
        return [scale_layer(x, s) for x, s in zip(xs, scales)]

    # Tiny homogeneous members: one fused call over a leading ensemble axis.
    orig_shape = shape0
    dim = orig_shape[-1]
    rows = math.prod(orig_shape[:-1])
    f = _fold_factor(rows, dim)
    rows_e, dim_e = rows // f, dim * f

    x_stack = jnp.stack([x.reshape(rows_e, dim_e) for x in xs], axis=0)
    s_stack = jnp.stack(
        [jnp.tile(s, f) if f > 1 else s for s in scales], axis=0
    ).reshape(n, 1, dim_e)

    out_dtype = jnp.result_type(dtype0, scales[0].dtype)
    cfg = _device_config()
    tr, tc = _choose_tiles(rows_e, dim_e, out_dtype)
    grid = (n, pl.cdiv(rows_e, tr), pl.cdiv(dim_e, tc))

    out = pl.pallas_call(
        _scale_kernel,
        out_shape=jax.ShapeDtypeStruct((n, rows_e, dim_e), out_dtype),
        grid_spec=pltpu.PrefetchScalarGridSpec(
            num_scalar_prefetch=0,
            grid=grid,
            in_specs=[
                pl.BlockSpec((1, tr, tc), lambda e, i, j: (e, i, j)),
                pl.BlockSpec((1, 1, tc), lambda e, i, j: (e, 0, j)),
            ],
            out_specs=pl.BlockSpec((1, tr, tc), lambda e, i, j: (e, i, j)),
        ),
        compiler_params=pltpu.CompilerParams(
            dimension_semantics=("parallel", "parallel", "parallel"),
            vmem_limit_bytes=cfg["vmem_limit"],
        ),
    )(x_stack, s_stack)

    return [out[e].reshape(orig_shape) for e in range(n)]


class LWS:
    """JAX/Pallas re-implementation of the PyTorch LWS module (forward only)."""

    def __init__(self, output: int, ensemble_name: str = "none",
                 ensemble_num: int = None):
        self.ensemble_name = ensemble_name
        self.ensemble_num = ensemble_num
        if ensemble_name == "none":
            self.scale = jnp.ones((output,), dtype=jnp.float32)       # torch.ones init
        elif ensemble_name == "tail":
            self.scales = [jnp.ones((output,), dtype=jnp.float32)
                           for _ in range(ensemble_num)]
        else:
            raise Exception(
                "Unsupported config['ensemble_info']['name'], "
                "expect in ['none', 'tail']"
            )

    def __call__(self, x):
        if self.ensemble_name == "none":
            return scale_layer(x, self.scale)
        return scale_layer_ensemble(x, self.scales)


if __name__ == "__main__":
    key = jax.random.PRNGKey(0)
    k1, k2, k3, k4, k5 = jax.random.split(key, 5)

    # --- 'none': dim=32 -> lane folding to 128-wide blocks -------------------
    d = 32
    x = jax.random.normal(k1, (2, 8, d), dtype=jnp.float32)
    lws_none = LWS(d, ensemble_name="none")
    lws_none.scale = 1.0 + 0.1 * jnp.arange(d, dtype=jnp.float32)  # non-trivial params
    y = jax.block_until_ready(lws_none(x))
    assert jnp.allclose(y, x * lws_none.scale, atol=1e-6), "mismatch 'none' dim=32"

    # --- 'none': irregular dim=100, non-foldable rows -> full-extent blocks --
    d2 = 100
    x_irr = jax.random.normal(k2, (4, 37, d2), dtype=jnp.float32)
    lws_irr = LWS(d2, ensemble_name="none")
    lws_irr.scale = 1.0 - 0.5 * jnp.arange(d2, dtype=jnp.float32) / d2
    y_irr = jax.block_until_ready(lws_irr(x_irr))
    assert jnp.allclose(y_irr, x_irr * lws_irr.scale, atol=1e-6), "mismatch 'none' dim=100"

    # --- 'none': bf16 input with f32 scale -> promoted f32 output ------------
    x_bf = jax.random.normal(k5, (2, 8, d), dtype=jnp.bfloat16)
    y_bf = jax.block_until_ready(lws_none(x_bf))
    assert y_bf.dtype == jnp.float32
    assert jnp.allclose(y_bf, x_bf.astype(jnp.float32) * lws_none.scale, atol=1e-6), \
        "mismatch 'none' bf16 promotion"

    # --- 'tail': tiny homogeneous members -> single fused kernel -------------
    ensemble_num = 2
    xs = [
        jax.random.normal(k3, (2, 8, d), dtype=jnp.float32),
        jax.random.normal(k4, (2, 8, d), dtype=jnp.float32),
    ]
    lws_tail = LWS(d, ensemble_name="tail", ensemble_num=ensemble_num)
    lws_tail.scales = [
        1.0 + 0.1 * (i + 1) * jnp.arange(d, dtype=jnp.float32)
        for i in range(ensemble_num)
    ]
    ys = jax.block_until_ready(lws_tail(xs))
    for yi, xi, si in zip(ys, xs, lws_tail.scales):
        assert jnp.allclose(yi, xi * si, atol=1e-6), "mismatch 'tail' path"

    print("KERNEL_OK")
</pallas_src>

<mosaic_0001>
module attributes {stable_mosaic.version = 11 : i64} {
  func.func @_scale_kernel(%arg0: i32, %arg1: i32, %arg2: memref<4x128xf32, #tpu.memory_space<vmem>>, %arg3: memref<1x128xf32, #tpu.memory_space<vmem>>, %arg4: memref<4x128xf32, #tpu.memory_space<vmem>>) attributes {dimension_semantics = [#tpu.dimension_semantics<parallel>, #tpu.dimension_semantics<parallel>], iteration_bounds = array<i64: 1, 1>, scalar_prefetch = 0 : i64, scratch_operands = 0 : i64, tpu.core_type = #tpu.core_type<tc>, window_params = [{transform_indices = @transform_0, window_bounds = array<i64: 4, 128>}, {transform_indices = @transform_1, window_bounds = array<i64: 1, 128>}, {transform_indices = @transform_2, window_bounds = array<i64: 4, 128>}]} {
    %c0 = arith.constant 0 : index
    %c0_0 = arith.constant 0 : index
    %0 = vector.load %arg2[%c0, %c0_0] : memref<4x128xf32, #tpu.memory_space<vmem>>, vector<4x128xf32>
    %c0_1 = arith.constant 0 : index
    %c0_2 = arith.constant 0 : index
    %1 = vector.load %arg3[%c0_1, %c0_2] : memref<1x128xf32, #tpu.memory_space<vmem>>, vector<1x128xf32>
    %2 = vector.broadcast %1 : vector<1x128xf32> to vector<4x128xf32>
    %3 = arith.mulf %0, %2 : vector<4x128xf32>
    %c0_3 = arith.constant 0 : index
    %c0_4 = arith.constant 0 : index
    %4 = vector.load %arg4[%c0_3, %c0_4] : memref<4x128xf32, #tpu.memory_space<vmem>>, vector<4x128xf32>
    tpu.vector_store %arg4[%c0_3, %c0_4], %3 {strides = array<i32>} : memref<4x128xf32, #tpu.memory_space<vmem>>, vector<4x128xf32>,
    return
  }
  func.func @transform_0(%arg0: i32, %arg1: i32) -> (i32, i32) {
    %c0_i32 = arith.constant 0 : i32
    return %arg0, %arg1 : i32, i32
  }
  func.func @transform_1(%arg0: i32, %arg1: i32) -> (i32, i32) {
    %c0_i32 = arith.constant 0 : i32
    %c0_i32_0 = arith.constant 0 : i32
    return %c0_i32, %arg1 : i32, i32
  }
  func.func @transform_2(%arg0: i32, %arg1: i32) -> (i32, i32) {
    %c0_i32 = arith.constant 0 : i32
    return %arg0, %arg1 : i32, i32
  }
}

</mosaic_0001>

<bundles_post_ra>
// kernel: tpu_custom_call.1
= control target key start
LH: loop header
LB: loop body
LE: loop exit
PB: predicated region body
PF: predicated region fallthrough
CT: control target
= control target key end

     0   :  { %7 = vsyncpa [#allocation3], 0  ;;  %s174_s0 = inlined_call_operand.hbm [shape: f32[4,128], index: 0, kind: input, shape index: {}]   ;;  %s175_s1 = inlined_call_operand.hbm [shape: f32[1,128], index: 1, kind: input, shape index: {}]   ;;  %s176_s2 = inlined_call_operand.hbm [shape: f32[4,128], index: 2, kind: output, shape index: {}]  }
   0x1   :  { %8 = vsyncpa [#allocation6], 0 }
   0x2   :  { %9 = vsyncpa [#allocation4], 0  ;;  %s15_s11 = sshll.u32 %s174_s0, 4  ;;  %s147_s12 = smov [#allocation2]   ;;  %s16_s11 = int_to_ptr.hbm [resolvable:$true] %s15_s11 }
   0x3   :  { %s17_s13 = sshll.u32 %s147_s12, 4  ;;  %s26_s16 = sshll.u32 %s175_s1, 4  ;;  %s18_s13 = int_to_ptr.vmem [resolvable:$true] %s17_s13  ;;  %s27_s16 = int_to_ptr.hbm [resolvable:$true] %s26_s16 }
   0x4   :  { %20 = dma.hbm_to_vmem [thread:$0]  %s16_s11, 64, %s18_s13, [#allocation3]  }
   0x5   :  { %s148_s17 = smov [#allocation5]  }
   0x6   :  { %s28_s18 = sshll.u32 %s148_s17, 4  ;;  %s29_s18 = int_to_ptr.vmem [resolvable:$true] %s28_s18 }
   0x7   :  { %31 = dma.hbm_to_vmem [thread:$0]  %s27_s16, 16, %s29_s18, [#allocation6]  }
   0x8   :  { %141 = dma.done.wait [#allocation3], 64  }
   0x9   :  { %142 = vsyncadd [#allocation3], 4294967232 }
   0xa   :  { %143 = dma.done.wait [#allocation6], 16  }
   0xb   :  { %144 = vsyncadd [#allocation6], 4294967280  ;;  %s149_s19 = smov [#allocation7]   ;;  %s54_s22 = sshll.u32 %s176_s2, 4  ;;  %v40_v0 = vld [vmem:[#allocation2] sm:$0xf]  ;;  %s55_s22 = int_to_ptr.hbm [resolvable:$true] %s54_s22 }
   0xc   :  { %s52_s0 = sshll.u32 %s149_s19, 4  ;;  %v68_v1 = vld [vmem:[#allocation5] ss:$0 sm:$0xff]  ;;  %s53_s0 = int_to_ptr.vmem [resolvable:$true] %s52_s0 }
   0xd   :  { %v45_v2 = vmul.f32 %v68_v1, %v40_v0 }
   0xf   :  { %46 = vst [vmem:[#allocation7] sm:$0xf] %v45_v2 }
  0x10   :  { %57 = dma.vmem_to_hbm [thread:$0]  %s53_s0, 64, %s55_s22, [#allocation4]  }
  0x11   :  { %145 = dma.done.wait [#allocation4], 64  }
  0x12   :  { %146 = vsyncadd [#allocation4], 4294967232 }
  0x13   :  { %62 = vsyncpa [#allocation3], 1 }
  0x14   :  { %63 = vsyncpa [#allocation6], 1 }
  0x15   :  { %64 = vsyncpa [#allocation4], 1 }

</bundles_post_ra>
